<compile_context>
chip_gen: v7x
topology: tpu7x:2x2x1
jax: 0.10.0
libtpu: 0.0.40
codegen_flags: <defaults>
</compile_context>

<pallas_src>
import jax
import jax.numpy as jnp
from jax.experimental import pallas as pl
from jax.experimental.pallas import tpu as pltpu

HIDDEN = 100
LANE = 128
SUBLANE = 8
MAX_TB = 1024  # rows per batch tile; amortizes ~0.35us per-grid-step overhead


def _round_up(n, m):
    return ((n + m - 1) // m) * m


def _ceil_div(a, b):
    return -(-a // b)


def actor_kernel(x_ref,
                 w1_ref, b1_ref,
                 w2_ref, b2_ref,
                 w3_ref, b3_ref,
                 w4_ref, b4_ref,
                 out_ref):
    x = x_ref[...]

    # fc1..fc3 + relu.  Hidden dims are zero-padded 100->128 in the weights
    # (one-time prep), which is exact: padded lanes stay 0 through the relus
    # and contribute nothing downstream.
    h = jnp.maximum(
        jnp.dot(x, w1_ref[...], preferred_element_type=jnp.float32) + b1_ref[...], 0.0)
    h = jnp.maximum(
        jnp.dot(h, w2_ref[...], preferred_element_type=jnp.float32) + b2_ref[...], 0.0)
    h = jnp.maximum(
        jnp.dot(h, w3_ref[...], preferred_element_type=jnp.float32) + b3_ref[...], 0.0)

    # fc4 at the natural output width (no padded logit lanes -> no masking)
    # followed by a numerically stable softmax along the last axis.
    logits = jnp.dot(h, w4_ref[...], preferred_element_type=jnp.float32) + b4_ref[...]
    m = jnp.max(logits, axis=-1, keepdims=True)
    e = jnp.exp(logits - m)
    denom = jnp.sum(e, axis=-1, keepdims=True)
    out_ref[...] = e * pl.reciprocal(denom, approx=False)


def prepare_params(params):
    """One-time prep: cast to f32 and zero-pad only the HIDDEN(=100) dims to 128.

    Input and output feature dims keep their natural widths, so activation
    I/O stays un-padded in HBM.  Call this once (at init / param load), not
    per forward.
    """
    w1, b1, w2, b2, w3, b3, w4, b4 = [p.astype(jnp.float32) for p in params]
    pad_h = _round_up(HIDDEN, LANE) - HIDDEN
    w1 = jnp.pad(w1, ((0, 0), (0, pad_h)))
    b1 = jnp.pad(b1, ((0, 0), (0, pad_h)))
    w2 = jnp.pad(w2, ((0, pad_h), (0, pad_h)))
    b2 = jnp.pad(b2, ((0, 0), (0, pad_h)))
    w3 = jnp.pad(w3, ((0, pad_h), (0, pad_h)))
    b3 = jnp.pad(b3, ((0, 0), (0, pad_h)))
    w4 = jnp.pad(w4, ((0, pad_h), (0, 0)))
    # b4 stays at (1, out_size).
    return (w1, b1, w2, b2, w3, b3, w4, b4)


def _choose_tb(batch):
    """Batch tile: multiple of 8 (f32 sublane), as large as possible (fewer
    grid steps), but >=2 grid steps when the batch allows it so the
    "parallel" batch axis can be split across the two v7x TensorCores, and
    sized adaptively so ragged batches (e.g. 300) don't over-pad."""
    b8 = _round_up(max(batch, 1), SUBLANE)
    if b8 <= SUBLANE:
        return SUBLANE
    n_tiles = max(2, _ceil_div(b8, MAX_TB))
    return _round_up(_ceil_div(b8, n_tiles), SUBLANE)


def actor_forward(x, prepared_params, *, tb=None):
    """x: (batch, in_features); prepared_params = prepare_params((w1,b1,...,w4,b4))."""
    batch, in_features = x.shape
    out_size = prepared_params[-1].shape[-1]

    if tb is None:
        tb = _choose_tb(batch)
    b_pad = _round_up(batch, tb)

    x_p = x.astype(jnp.float32)
    if b_pad != batch:
        x_p = jnp.pad(x_p, ((0, b_pad - batch), (0, 0)))

    def _const(i):
        return (0, 0)

    # x / out are tiled over the batch only; their last dims equal the full
    # array dims (full-dim exemption from the (8,128) rule), so no lane
    # padding and no masked-lane handling is needed.  Weights/biases use
    # constant index maps and stay resident in VMEM across grid steps.
    in_specs = [pl.BlockSpec((tb, in_features), lambda i: (i, 0))]
    for p in prepared_params:
        in_specs.append(pl.BlockSpec(p.shape, _const))
    out_specs = pl.BlockSpec((tb, out_size), lambda i: (i, 0))

    out = pl.pallas_call(
        actor_kernel,
        out_shape=jax.ShapeDtypeStruct((b_pad, out_size), jnp.float32),
        grid=(b_pad // tb,),
        in_specs=in_specs,
        out_specs=out_specs,
        compiler_params=pltpu.CompilerParams(
            dimension_semantics=("parallel",)),
    )(x_p, *prepared_params)

    if b_pad != batch:
        out = out[:batch]
    return out


def init_params(key, input_size, output_size):
    """Deterministic synthetic init (shapes match the nn.Linear layers, transposed)."""
    ks = jax.random.split(key, 8)

    def lin(kw, kb, fan_in, fan_out):
        bound = 1.0 / jnp.sqrt(fan_in)
        w = jax.random.uniform(kw, (fan_in, fan_out), jnp.float32, -bound, bound)
        b = jax.random.uniform(kb, (1, fan_out), jnp.float32, -bound, bound)
        return w, b

    w1, b1 = lin(ks[0], ks[1], input_size, HIDDEN)
    w2, b2 = lin(ks[2], ks[3], HIDDEN, HIDDEN)
    w3, b3 = lin(ks[4], ks[5], HIDDEN, HIDDEN)
    w4, b4 = lin(ks[6], ks[7], HIDDEN, output_size)
    return (w1, b1, w2, b2, w3, b3, w4, b4)


def actor_reference(x, params):
    w1, b1, w2, b2, w3, b3, w4, b4 = params
    h = jnp.maximum(x @ w1 + b1, 0.0)
    h = jnp.maximum(h @ w2 + b2, 0.0)
    h = jnp.maximum(h @ w3 + b3, 0.0)
    return jax.nn.softmax(h @ w4 + b4, axis=-1)


if __name__ == "__main__":
    key = jax.random.PRNGKey(0)
    k_x, k_p, k_x2 = jax.random.split(key, 3)

    batch, input_size, output_size = 4, 8, 6
    x = jax.random.normal(k_x, (batch, input_size), jnp.float32)
    params = init_params(k_p, input_size, output_size)
    prepared = prepare_params(params)  # one-time prep, outside the hot path

    # Small-batch check (single tile).
    out = jax.block_until_ready(actor_forward(x, prepared))
    ref = actor_reference(x, params)
    assert out.shape == (batch, output_size)
    assert jnp.allclose(out, ref, atol=1e-5, rtol=1e-5), "mismatch vs reference (small batch)"
    assert jnp.allclose(jnp.sum(out, axis=-1), 1.0, atol=1e-5)

    # Larger ragged batch: exercises the adaptive batch-tiled grid (2 tiles of
    # 152 rows for batch=300) and the batch-pad/slice path.
    batch2 = 300
    x2 = jax.random.normal(k_x2, (batch2, input_size), jnp.float32)
    out2 = jax.block_until_ready(actor_forward(x2, prepared))
    ref2 = actor_reference(x2, params)
    assert out2.shape == (batch2, output_size)
    assert jnp.allclose(out2, ref2, atol=1e-5, rtol=1e-5), "mismatch vs reference (tiled batch)"
    assert jnp.allclose(jnp.sum(out2, axis=-1), 1.0, atol=1e-5)

    print("KERNEL_OK")
</pallas_src>

<mosaic_0001>
module attributes {stable_mosaic.version = 11 : i64} {
  func.func @actor_kernel(%arg0: i32, %arg1: memref<8x8xf32, #tpu.memory_space<vmem>>, %arg2: memref<8x128xf32, #tpu.memory_space<vmem>>, %arg3: memref<1x128xf32, #tpu.memory_space<vmem>>, %arg4: memref<128x128xf32, #tpu.memory_space<vmem>>, %arg5: memref<1x128xf32, #tpu.memory_space<vmem>>, %arg6: memref<128x128xf32, #tpu.memory_space<vmem>>, %arg7: memref<1x128xf32, #tpu.memory_space<vmem>>, %arg8: memref<128x6xf32, #tpu.memory_space<vmem>>, %arg9: memref<1x6xf32, #tpu.memory_space<vmem>>, %arg10: memref<8x6xf32, #tpu.memory_space<vmem>>) attributes {dimension_semantics = [#tpu.dimension_semantics<parallel>], iteration_bounds = array<i64: 1>, scalar_prefetch = 0 : i64, scratch_operands = 0 : i64, tpu.core_type = #tpu.core_type<tc>, window_params = [{transform_indices = @transform_0, window_bounds = array<i64: 8, 8>}, {pipeline_mode = #tpu.pipeline_mode<synchronous>, transform_indices = @transform_1, window_bounds = array<i64: 8, 128>}, {pipeline_mode = #tpu.pipeline_mode<synchronous>, transform_indices = @transform_2, window_bounds = array<i64: 1, 128>}, {pipeline_mode = #tpu.pipeline_mode<synchronous>, transform_indices = @transform_3, window_bounds = array<i64: 128, 128>}, {pipeline_mode = #tpu.pipeline_mode<synchronous>, transform_indices = @transform_4, window_bounds = array<i64: 1, 128>}, {pipeline_mode = #tpu.pipeline_mode<synchronous>, transform_indices = @transform_5, window_bounds = array<i64: 128, 128>}, {pipeline_mode = #tpu.pipeline_mode<synchronous>, transform_indices = @transform_6, window_bounds = array<i64: 1, 128>}, {pipeline_mode = #tpu.pipeline_mode<synchronous>, transform_indices = @transform_7, window_bounds = array<i64: 128, 6>}, {pipeline_mode = #tpu.pipeline_mode<synchronous>, transform_indices = @transform_8, window_bounds = array<i64: 1, 6>}, {transform_indices = @transform_9, window_bounds = array<i64: 8, 6>}]} {
    %c0 = arith.constant 0 : index
    %c0_0 = arith.constant 0 : index
    %0 = vector.load %arg1[%c0, %c0_0] : memref<8x8xf32, #tpu.memory_space<vmem>>, vector<8x8xf32>
    %c0_1 = arith.constant 0 : index
    %c0_2 = arith.constant 0 : index
    %1 = vector.load %arg2[%c0_1, %c0_2] : memref<8x128xf32, #tpu.memory_space<vmem>>, vector<8x128xf32>
    %cst = arith.constant dense<0.000000e+00> : vector<8x128xf32>
    %2 = tpu.matmul %0, %1, %cst {dimension_numbers = #tpu.dot_dimension_numbers<[1], [0], [0], [1], [0, 0, 1, 1], [], []>} : vector<8x8xf32>, vector<8x128xf32>, vector<8x128xf32> -> vector<8x128xf32>
    %c0_3 = arith.constant 0 : index
    %c0_4 = arith.constant 0 : index
    %3 = vector.load %arg3[%c0_3, %c0_4] : memref<1x128xf32, #tpu.memory_space<vmem>>, vector<1x128xf32>
    %4 = vector.broadcast %3 : vector<1x128xf32> to vector<8x128xf32>
    %5 = arith.addf %2, %4 : vector<8x128xf32>
    %cst_5 = arith.constant 0.000000e+00 : f32
    %6 = vector.broadcast %cst_5 : f32 to vector<8x128xf32>
    %7 = arith.maximumf %5, %6 : vector<8x128xf32>
    %c0_6 = arith.constant 0 : index
    %c0_7 = arith.constant 0 : index
    %8 = vector.load %arg4[%c0_6, %c0_7] : memref<128x128xf32, #tpu.memory_space<vmem>>, vector<128x128xf32>
    %cst_8 = arith.constant dense<0.000000e+00> : vector<8x128xf32>
    %9 = tpu.matmul %7, %8, %cst_8 {dimension_numbers = #tpu.dot_dimension_numbers<[1], [0], [0], [1], [0, 0, 1, 1], [], []>} : vector<8x128xf32>, vector<128x128xf32>, vector<8x128xf32> -> vector<8x128xf32>
    %c0_9 = arith.constant 0 : index
    %c0_10 = arith.constant 0 : index
    %10 = vector.load %arg5[%c0_9, %c0_10] : memref<1x128xf32, #tpu.memory_space<vmem>>, vector<1x128xf32>
    %11 = vector.broadcast %10 : vector<1x128xf32> to vector<8x128xf32>
    %12 = arith.addf %9, %11 : vector<8x128xf32>
    %cst_11 = arith.constant 0.000000e+00 : f32
    %13 = vector.broadcast %cst_11 : f32 to vector<8x128xf32>
    %14 = arith.maximumf %12, %13 : vector<8x128xf32>
    %c0_12 = arith.constant 0 : index
    %c0_13 = arith.constant 0 : index
    %15 = vector.load %arg6[%c0_12, %c0_13] : memref<128x128xf32, #tpu.memory_space<vmem>>, vector<128x128xf32>
    %cst_14 = arith.constant dense<0.000000e+00> : vector<8x128xf32>
    %16 = tpu.matmul %14, %15, %cst_14 {dimension_numbers = #tpu.dot_dimension_numbers<[1], [0], [0], [1], [0, 0, 1, 1], [], []>} : vector<8x128xf32>, vector<128x128xf32>, vector<8x128xf32> -> vector<8x128xf32>
    %c0_15 = arith.constant 0 : index
    %c0_16 = arith.constant 0 : index
    %17 = vector.load %arg7[%c0_15, %c0_16] : memref<1x128xf32, #tpu.memory_space<vmem>>, vector<1x128xf32>
    %18 = vector.broadcast %17 : vector<1x128xf32> to vector<8x128xf32>
    %19 = arith.addf %16, %18 : vector<8x128xf32>
    %cst_17 = arith.constant 0.000000e+00 : f32
    %20 = vector.broadcast %cst_17 : f32 to vector<8x128xf32>
    %21 = arith.maximumf %19, %20 : vector<8x128xf32>
    %c0_18 = arith.constant 0 : index
    %c0_19 = arith.constant 0 : index
    %22 = vector.load %arg8[%c0_18, %c0_19] : memref<128x6xf32, #tpu.memory_space<vmem>>, vector<128x6xf32>
    %cst_20 = arith.constant dense<0.000000e+00> : vector<8x6xf32>
    %23 = tpu.matmul %21, %22, %cst_20 {dimension_numbers = #tpu.dot_dimension_numbers<[1], [0], [0], [1], [0, 0, 1, 1], [], []>} : vector<8x128xf32>, vector<128x6xf32>, vector<8x6xf32> -> vector<8x6xf32>
    %c0_21 = arith.constant 0 : index
    %c0_22 = arith.constant 0 : index
    %24 = vector.load %arg9[%c0_21, %c0_22] : memref<1x6xf32, #tpu.memory_space<vmem>>, vector<1x6xf32>
    %25 = vector.broadcast %24 : vector<1x6xf32> to vector<8x6xf32>
    %26 = arith.addf %23, %25 : vector<8x6xf32>
    %cst_23 = arith.constant dense<0xFF800000> : vector<8xf32>
    %27 = vector.multi_reduction <maximumf>, %26, %cst_23 [1] : vector<8x6xf32> to vector<8xf32>
    %28 = vector.shape_cast %27 : vector<8xf32> to vector<8x1xf32>
    %29 = vector.broadcast %28 : vector<8x1xf32> to vector<8x6xf32>
    %30 = arith.subf %26, %29 : vector<8x6xf32>
    %31 = math.exp %30 : vector<8x6xf32>
    %cst_24 = arith.constant dense<0.000000e+00> : vector<8xf32>
    %32 = vector.multi_reduction <add>, %31, %cst_24 [1] : vector<8x6xf32> to vector<8xf32>
    %33 = vector.shape_cast %32 : vector<8xf32> to vector<8x1xf32>
    %34 = tpu.reciprocal %33 : vector<8x1xf32> -> vector<8x1xf32>
    %35 = vector.broadcast %34 : vector<8x1xf32> to vector<8x6xf32>
    %36 = arith.mulf %31, %35 : vector<8x6xf32>
    %c0_25 = arith.constant 0 : index
    %c0_26 = arith.constant 0 : index
    %37 = vector.load %arg10[%c0_25, %c0_26] : memref<8x6xf32, #tpu.memory_space<vmem>>, vector<8x6xf32>
    tpu.vector_store %arg10[%c0_25, %c0_26], %36 {strides = array<i32>} : memref<8x6xf32, #tpu.memory_space<vmem>>, vector<8x6xf32>,
    return
  }
  func.func @transform_0(%arg0: i32) -> (i32, i32) {
    %c0_i32 = arith.constant 0 : i32
    %c0_i32_0 = arith.constant 0 : i32
    return %arg0, %c0_i32 : i32, i32
  }
  func.func @transform_1(%arg0: i32) -> (i32, i32) {
    %c0_i32 = arith.constant 0 : i32
    %c0_i32_0 = arith.constant 0 : i32
    %c0_i32_1 = arith.constant 0 : i32
    return %c0_i32, %c0_i32_0 : i32, i32
  }
  func.func @transform_2(%arg0: i32) -> (i32, i32) {
    %c0_i32 = arith.constant 0 : i32
    %c0_i32_0 = arith.constant 0 : i32
    %c0_i32_1 = arith.constant 0 : i32
    return %c0_i32, %c0_i32_0 : i32, i32
  }
  func.func @transform_3(%arg0: i32) -> (i32, i32) {
    %c0_i32 = arith.constant 0 : i32
    %c0_i32_0 = arith.constant 0 : i32
    %c0_i32_1 = arith.constant 0 : i32
    return %c0_i32, %c0_i32_0 : i32, i32
  }
  func.func @transform_4(%arg0: i32) -> (i32, i32) {
    %c0_i32 = arith.constant 0 : i32
    %c0_i32_0 = arith.constant 0 : i32
    %c0_i32_1 = arith.constant 0 : i32
    return %c0_i32, %c0_i32_0 : i32, i32
  }
  func.func @transform_5(%arg0: i32) -> (i32, i32) {
    %c0_i32 = arith.constant 0 : i32
    %c0_i32_0 = arith.constant 0 : i32
    %c0_i32_1 = arith.constant 0 : i32
    return %c0_i32, %c0_i32_0 : i32, i32
  }
  func.func @transform_6(%arg0: i32) -> (i32, i32) {
    %c0_i32 = arith.constant 0 : i32
    %c0_i32_0 = arith.constant 0 : i32
    %c0_i32_1 = arith.constant 0 : i32
    return %c0_i32, %c0_i32_0 : i32, i32
  }
  func.func @transform_7(%arg0: i32) -> (i32, i32) {
    %c0_i32 = arith.constant 0 : i32
    %c0_i32_0 = arith.constant 0 : i32
    %c0_i32_1 = arith.constant 0 : i32
    return %c0_i32, %c0_i32_0 : i32, i32
  }
  func.func @transform_8(%arg0: i32) -> (i32, i32) {
    %c0_i32 = arith.constant 0 : i32
    %c0_i32_0 = arith.constant 0 : i32
    %c0_i32_1 = arith.constant 0 : i32
    return %c0_i32, %c0_i32_0 : i32, i32
  }
  func.func @transform_9(%arg0: i32) -> (i32, i32) {
    %c0_i32 = arith.constant 0 : i32
    %c0_i32_0 = arith.constant 0 : i32
    return %arg0, %c0_i32 : i32, i32
  }
}

</mosaic_0001>

<bundles_post_ra>
// kernel: tpu_custom_call.1
= control target key start
LH: loop header
LB: loop body
LE: loop exit
PB: predicated region body
PF: predicated region fallthrough
CT: control target
= control target key end

     0   :  { %14 = vsyncpa [#allocation3], 0  ;;  %s1025_s0 = inlined_call_operand.vmem [shape: f32[8,8], index: 0, kind: input, shape index: {}]   ;;  %s1026_s1 = inlined_call_operand.hbm [shape: f32[8,128], index: 1, kind: input, shape index: {}]   ;;  %s1027_s2 = inlined_call_operand.vmem [shape: f32[1,128], index: 2, kind: input, shape index: {}]   ;;  %s1028_s3 = inlined_call_operand.vmem [shape: f32[128,128], index: 3, kind: input, shape index: {}]   ;;  %s1029_s4 = inlined_call_operand.vmem [shape: f32[1,128], index: 4, kind: input, shape index: {}]   ;;  %s1030_s5 = inlined_call_operand.hbm [shape: f32[128,128], index: 5, kind: input, shape index: {}]   ;;  %s1031_s6 = inlined_call_operand.vmem [shape: f32[1,128], index: 6, kind: input, shape index: {}]   ;;  %s1032_s7 = inlined_call_operand.vmem [shape: f32[128,6], index: 7, kind: input, shape index: {}]   ;;  %s1033_s8 = inlined_call_operand.vmem [shape: f32[1,6], index: 8, kind: input, shape index: {}]   ;;  %s1034_s9 = inlined_call_operand.hbm [shape: f32[8,6], index: 9, kind: output, shape index: {}]  }
   0x1   :  { %15 = vsyncpa [#allocation6], 0 }
   0x2   :  { %16 = vsyncpa [#allocation4], 0  ;;  %s777_s30 = smov [#allocation2]   ;;  %s778_s11 = smov [#allocation5]  }
   0x3   :  { %s25_s10 = sshll.u32 %s777_s30, 4  ;;  %s40_s12 = sshll.u32 %s778_s11, 4  ;;  %s26_s10 = int_to_ptr.vmem [resolvable:$true] %s25_s10  ;;  %s835_s12 = int_to_ptr.vmem [resolvable:$true] %s40_s12 }
   0x4   :  { %s705_s15 = scalar_lea.hbm %s1026_s1, 128 }
   0x5   :  { %p706_p0 = scmp.ne.s32.totalorder %s1026_s1, %s705_s15  ;;  %p709_p1 = scmp.lt.u32.totalorder %s705_s15, %s1026_s1 }
   0x7   :  { %p711_p2 = pnand %p709_p1, %p706_p0 }
   0x9   :  { %714 = shalt.err (!%p711_p2)
}
   0xa   :  { %s715_s20 = scalar_lea.vmem %s26_s10, 128  ;;  %p720_p4 = scmp.lt.s32.totalorder %s26_s10, %s26_s10 }
   0xb   :  { %p716_p3 = scmp.ne.s32.totalorder %s26_s10, %s715_s20  ;;  %p721_p5 = scmp.lt.s32.totalorder %s715_s20, %s715_s20 }
   0xd   :  { %p722_p6 = por %p721_p5, %p720_p4 }
   0xf   :  { %p723_p7 = pnand %p722_p6, %p716_p3 }
  0x11   :  { %726 = shalt.err (!%p723_p7)
}
  0x12   :  { %28 = dma.hbm_to_vmem [thread:$0]  %s1026_s1, 128, %s26_s10, [#allocation3]  }
  0x13   :  { %s727_s25 = scalar_lea.hbm %s1030_s5, 2048 }
  0x14   :  { %p728_p8 = scmp.ne.s32.totalorder %s1030_s5, %s727_s25  ;;  %p731_p9 = scmp.lt.u32.totalorder %s727_s25, %s1030_s5 }
  0x16   :  { %p733_p10 = pnand %p731_p9, %p728_p8 }
  0x18   :  { %736 = shalt.err (!%p733_p10)
}
  0x19   :  { %s737_s30 = scalar_lea.vmem %s835_s12, 2048  ;;  %p742_p12 = scmp.lt.s32.totalorder %s835_s12, %s835_s12 }
  0x1a   :  { %p738_p11 = scmp.ne.s32.totalorder %s835_s12, %s737_s30  ;;  %p743_p13 = scmp.lt.s32.totalorder %s737_s30, %s737_s30 }
  0x1c   :  { %p744_p0 = por %p743_p13, %p742_p12 }
  0x1e   :  { %p745_p1 = pnand %p744_p0, %p738_p11 }
  0x20   :  { %748 = shalt.err (!%p745_p1)
}
  0x21   :  { %s779_s1 = smov 128   ;;  %s780_s10 = smov 8  }
  0x22   :  { %46 = dma.hbm_to_vmem [thread:$0]  %s1030_s5, 2048, %s835_s12, [#allocation6], %s779_s1, %s779_s1, %s780_s10  }
  0x23   :  { %771 = dma.done.wait [#allocation3], 128  }
  0x24   :  { %772 = vsyncadd [#allocation3], 4294967168 }
  0x25   :  { %773 = dma.done.wait [#allocation6], 2048  }
  0x26   :  { %774 = vsyncadd [#allocation6], 4294965248  ;;  %v781_v0 = vmov 0.0   ;;  %vm782_vm0 = vmmov 0   ;;  %v783_v1 = vmov 0.0|0.0   ;;  %vm68_vm1 = vcmask 64512  }
  0x27   :  { %511 = vmatprep.subr.mxu0 %v781_v0  ;;  %513 = vmatprep.mubr.msk.f32.mxu0 %vm782_vm0, %v781_v0  ;;  %v60_v2 = vld [vmem:[#allocation2] sm:$0xff]  ;;  %v144_v5 = vld [vmem:[%s1028_s3 + $0x8] sm:$0xff]  ;;  %v145_v6 = vld [vmem:[%s1028_s3 + $0x10] sm:$0xff]  ;;  %vm424_vm2 = vcmask 48128  }
  0x28   :  { %621 = vmatprep.subr.bf16.mxu1 %v783_v1  ;;  %548 = vmatprep.mubr.msk.f32.mxu1 %vm782_vm0, %v781_v0  ;;  %v59_v3 = vld [vmem:[%s1025_s0] sm:$0xff]  ;;  %v146_v7 = vld [vmem:[%s1028_s3 + $0x18] sm:$0xff]  ;;  %v148_v11 = vld [vmem:[%s1028_s3 + $0x28] sm:$0xff] }
  0x29   :  { %v143_v4 = vld [vmem:[%s1028_s3] sm:$0xff]  ;;  %512 = vmatpush3.msra.mxu0 %v60_v2  ;;  %v625_v9 = vpack.c.bf16 %v146_v7, %v145_v6  ;;  %v149_v13 = vld [vmem:[%s1028_s3 + $0x30] sm:$0xff]  ;;  %v150_v14 = vld [vmem:[%s1028_s3 + $0x38] sm:$0xff] }
  0x2a   :  { %514 = vmatmul.mubr.msk.f32.vlgmr.msra.gmra.mrb[0].mxu0 %vm68_vm1, %v59_v3  ;;  %v622_v8 = vpack.c.bf16 %v144_v5, %v143_v4  ;;  %645 = vmatprep.subr.bf16.mxu0 %v783_v1  ;;  %v147_v10 = vld [vmem:[%s1028_s3 + $0x20] sm:$0xff]  ;;  %v631_v15 = vpack.c.bf16 %v150_v14, %v149_v13  ;;  %v152_v17 = vld [vmem:[%s1028_s3 + $0x48] sm:$0xff]  ;;  %v153_v19 = vld [vmem:[%s1028_s3 + $0x50] sm:$0xff] }
  0x2b   :  { %583 = vmatprep.mubr.msk.f32.mxu0 %vm782_vm0, %v781_v0  ;;  %v628_v12 = vpack.c.bf16 %v148_v11, %v147_v10  ;;  %v151_v16 = vld [vmem:[%s1028_s3 + $0x40] sm:$0xff]  ;;  %v154_v20 = vld [vmem:[%s1028_s3 + $0x58] sm:$0xff]  ;;  %v156_v23 = vld [vmem:[%s1028_s3 + $0x68] sm:$0xff] }
  0x2c   :  { %623 = vmatpush3.bf16.msra.mxu1 %v622_v8  ;;  %v634_v18 = vpack.c.bf16 %v152_v17, %v151_v16  ;;  %v637_v21 = vpack.c.bf16 %v154_v20, %v153_v19  ;;  %v155_v22 = vld [vmem:[%s1028_s3 + $0x60] sm:$0xff]  ;;  %v157_v25 = vld [vmem:[%s1028_s3 + $0x70] sm:$0xff]  ;;  %v158_v26 = vld [vmem:[%s1028_s3 + $0x78] sm:$0xff] }
  0x2d   :  { %624 = vmatprep.subr.bf16.mxu1 %v783_v1  ;;  %v640_v24 = vpack.c.bf16 %v156_v23, %v155_v22  ;;  %v643_v27 = vpack.c.bf16 %v158_v26, %v157_v25  ;;  %v237_v28 = vld [vmem:[#allocation5] sm:$0xff]  ;;  %v238_v29 = vld [vmem:[#allocation5 + $0x8] sm:$0xff]  ;;  %v239_v30 = vld [vmem:[#allocation5 + $0x10] sm:$0xff] }
  0x2e   :  { %v646_v31 = vpack.c.bf16 %v238_v29, %v237_v28  ;;  %v240_v32 = vld [vmem:[#allocation5 + $0x18] sm:$0xff]  ;;  %v241_v34 = vld [vmem:[#allocation5 + $0x20] sm:$0xff]  ;;  %v242_v35 = vld [vmem:[#allocation5 + $0x28] sm:$0xff] }
  0x2f   :  { %v649_v33 = vpack.c.bf16 %v240_v32, %v239_v30  ;;  %v652_v36 = vpack.c.bf16 %v242_v35, %v241_v34  ;;  %v243_v37 = vld [vmem:[#allocation5 + $0x30] sm:$0xff]  ;;  %v244_v38 = vld [vmem:[#allocation5 + $0x38] sm:$0xff]  ;;  %v245_v40 = vld [vmem:[#allocation5 + $0x40] sm:$0xff] }
  0x30   :  { %626 = vmatpush3.bf16.msra.mxu1 %v625_v9  ;;  %647 = vmatpush3.bf16.msra.mxu0 %v646_v31  ;;  %v655_v39 = vpack.c.bf16 %v244_v38, %v243_v37  ;;  %v246_v41 = vld [vmem:[#allocation5 + $0x48] sm:$0xff]  ;;  %v247_v43 = vld [vmem:[#allocation5 + $0x50] sm:$0xff]  ;;  %v248_v44 = vld [vmem:[#allocation5 + $0x58] sm:$0xff] }
  0x31   :  { %627 = vmatprep.subr.bf16.mxu1 %v783_v1  ;;  %648 = vmatprep.subr.bf16.mxu0 %v783_v1  ;;  %v658_v42 = vpack.c.bf16 %v246_v41, %v245_v40  ;;  %v661_v45 = vpack.c.bf16 %v248_v44, %v247_v43  ;;  %v249_v46 = vld [vmem:[#allocation5 + $0x60] sm:$0xff]  ;;  %v250_v47 = vld [vmem:[#allocation5 + $0x68] sm:$0xff]  ;;  %v453_v49 = vld [vmem:[%s1027_s2] ss:$0 sm:$0xff] }
  0x32   :  { %v664_v48 = vpack.c.bf16 %v250_v47, %v249_v46  ;;  %v251_v54 = vld [vmem:[#allocation5 + $0x70] sm:$0xff]  ;;  %v252_v55 = vld [vmem:[#allocation5 + $0x78] sm:$0xff]  ;;  %v332_v58 = vld [vmem:[%s1032_s7 + $0x8] sm:$0xff] }
  0x33   :  { %v667_v56 = vpack.c.bf16 %v252_v55, %v251_v54  ;;  %v331_v57 = vld [vmem:[%s1032_s7] sm:$0xff]  ;;  %v333_v59 = vld [vmem:[%s1032_s7 + $0x10] sm:$0xff]  ;;  %v334_v61 = vld [vmem:[%s1032_s7 + $0x18] sm:$0xff] }
  0x34   :  { %629 = vmatpush3.bf16.msra.mxu1 %v628_v12  ;;  %650 = vmatpush3.bf16.msra.mxu0 %v649_v33  ;;  %v670_v60 = vpack.c.bf16 %v332_v58, %v331_v57  ;;  %v673_v62 = vpack.c.bf16 %v334_v61, %v333_v59  ;;  %v335_v63 = vld [vmem:[%s1032_s7 + $0x20] sm:$0xff]  ;;  %v337_v3 = vld [vmem:[%s1032_s7 + $0x30] sm:$0xff]  ;;  %v338_v4 = vld [vmem:[%s1032_s7 + $0x38] sm:$0xff] }
  0x35   :  { %630 = vmatprep.subr.bf16.mxu1 %v783_v1  ;;  %651 = vmatprep.subr.bf16.mxu0 %v783_v1  ;;  %v679_v5 = vpack.c.bf16 %v338_v4, %v337_v3  ;;  %v339_v6 = vld [vmem:[%s1032_s7 + $0x40] sm:$0xff]  ;;  %v340_v7 = vld [vmem:[%s1032_s7 + $0x48] sm:$0xff]  ;;  %v341_v9 = vld [vmem:[%s1032_s7 + $0x50] sm:$0xff] }
  0x36   :  { %v682_v8 = vpack.c.bf16 %v340_v7, %v339_v6  ;;  %v342_v10 = vld [vmem:[%s1032_s7 + $0x58] sm:$0xff]  ;;  %v343_v12 = vld [vmem:[%s1032_s7 + $0x60] sm:$0xff]  ;;  %v344_v13 = vld [vmem:[%s1032_s7 + $0x68] sm:$0xff] }
  0x37   :  { %v685_v11 = vpack.c.bf16 %v342_v10, %v341_v9  ;;  %v688_v14 = vpack.c.bf16 %v344_v13, %v343_v12  ;;  %v345_v20 = vld [vmem:[%s1032_s7 + $0x70] sm:$0xff] }
  0x38   :  { %632 = vmatpush3.bf16.msra.mxu1 %v631_v15  ;;  %653 = vmatpush3.bf16.msra.mxu0 %v652_v36  ;;  %v455_v15 = vld [vmem:[%s1029_s4] ss:$0 sm:$0xff] }
  0x39   :  { %633 = vmatprep.subr.bf16.mxu1 %v783_v1  ;;  %654 = vmatprep.subr.bf16.mxu0 %v783_v1 }
  0x3c   :  { %635 = vmatpush3.bf16.msra.mxu1 %v634_v18  ;;  %656 = vmatpush3.bf16.msra.mxu0 %v655_v39 }
  0x3d   :  { %636 = vmatprep.subr.bf16.mxu1 %v783_v1  ;;  %657 = vmatprep.subr.bf16.mxu0 %v783_v1 }
  0x40   :  { %638 = vmatpush3.bf16.msra.mxu1 %v637_v21  ;;  %659 = vmatpush3.bf16.msra.mxu0 %v658_v42  ;;  %v346_v21 = vld [vmem:[%s1032_s7 + $0x78] sm:$0xff] }
  0x41   :  { %639 = vmatprep.subr.bf16.mxu1 %v783_v1  ;;  %660 = vmatprep.subr.bf16.mxu0 %v783_v1  ;;  %v691_v22 = vpack.c.bf16 %v346_v21, %v345_v20 }
  0x44   :  { %641 = vmatpush3.bf16.msra.mxu1 %v640_v24  ;;  %662 = vmatpush3.bf16.msra.mxu0 %v661_v45 }
  0x45   :  { %642 = vmatprep.subr.bf16.mxu1 %v783_v1  ;;  %663 = vmatprep.subr.bf16.mxu0 %v783_v1 }
  0x48   :  { %644 = vmatpush3.bf16.msra.mxu1 %v643_v27  ;;  %665 = vmatpush3.bf16.msra.mxu0 %v664_v48  ;;  %v457_v27 = vld [vmem:[%s1033_s8] ss:$0 sm:$0xff] }
  0x49   :  { %669 = vmatprep.subr.bf16.mxu1 %v783_v1  ;;  %666 = vmatprep.subr.bf16.mxu0 %v783_v1 }
  0x4c   :  { %668 = vmatpush3.bf16.msra.mxu0 %v667_v56 }
  0xfd   :  { %v138_v50 = vpop.f32.mrb[0].mxu0 }
  0xfe   :  { %v139_v51 = vadd.f32 %v453_v49, %v138_v50  ;;  %v515_v52 = vpop.f32.mrb[1].mxu0 }
 0x100   :  { %v142_v53 = vmax.f32 %v139_v51, 0.0 }
 0x102   :  { %549 = vmatmul.mubr.f32.vlgmr.msra.gmra.mrb[0].mxu1 %v142_v53 }
 0x103   :  { %618 = vmatprep.mubr.msk.f32.mxu1 %vm782_vm0, %v781_v0  ;;  %671 = vmatpush3.bf16.msra.mxu1 %v670_v60  ;;  %v336_v0 = vld [vmem:[%s1032_s7 + $0x28] sm:$0xff] }
 0x104   :  { %672 = vmatprep.subr.bf16.mxu1 %v783_v1  ;;  %v676_v2 = vpack.c.bf16 %v336_v0, %v335_v63 }
 0x107   :  { %674 = vmatpush3.bf16.msra.mxu1 %v673_v62 }
 0x108   :  { %675 = vmatprep.subr.bf16.mxu1 %v783_v1 }
 0x10b   :  { %677 = vmatpush3.bf16.msra.mxu1 %v676_v2 }
 0x10c   :  { %678 = vmatprep.subr.bf16.mxu1 %v783_v1 }
 0x10f   :  { %680 = vmatpush3.bf16.msra.mxu1 %v679_v5 }
 0x110   :  { %681 = vmatprep.subr.bf16.mxu1 %v783_v1 }
 0x113   :  { %683 = vmatpush3.bf16.msra.mxu1 %v682_v8 }
 0x114   :  { %684 = vmatprep.subr.bf16.mxu1 %v783_v1 }
 0x117   :  { %686 = vmatpush3.bf16.msra.mxu1 %v685_v11 }
 0x118   :  { %687 = vmatprep.subr.bf16.mxu1 %v783_v1 }
 0x11b   :  { %689 = vmatpush3.bf16.msra.mxu1 %v688_v14 }
 0x11c   :  { %690 = vmatprep.subr.bf16.mxu1 %v783_v1  ;;  %v456_v1 = vld [vmem:[%s1031_s6] ss:$0 sm:$0xff]  ;;  %s784_s6 = smov [#allocation7]  }
 0x11d   :  { %s443_s7 = sshll.u32 %s784_s6, 4  ;;  %s444_s7 = int_to_ptr.vmem [resolvable:$true] %s443_s7 }
 0x11e   :  { %s749_s8 = scalar_lea.vmem %s444_s7, 128  ;;  %p754_p3 = scmp.lt.s32.totalorder %s444_s7, %s444_s7 }
 0x11f   :  { %692 = vmatpush3.bf16.msra.mxu1 %v691_v22  ;;  %p750_p2 = scmp.ne.s32.totalorder %s444_s7, %s749_s8  ;;  %p755_p4 = scmp.lt.s32.totalorder %s749_s8, %s749_s8 }
 0x121   :  { %p756_p5 = por %p755_p4, %p754_p3 }
 0x123   :  { %p757_p6 = pnand %p756_p5, %p750_p2 }
 0x1d5   :  { %v232_v16 = vpop.f32.mrb[0].mxu1 }
 0x1d6   :  { %v233_v17 = vadd.f32 %v455_v15, %v232_v16  ;;  %v550_v18 = vpop.f32.mrb[1].mxu1 }
 0x1d8   :  { %v236_v19 = vmax.f32 %v233_v17, 0.0 }
 0x1da   :  { %584 = vmatmul.mubr.f32.vlgmr.msra.gmra.mrb[2].mxu0 %v236_v19 }
 0x2ad   :  { %v326_v23 = vpop.f32.mrb[2].mxu0 }
 0x2ae   :  { %v327_v24 = vadd.f32 %v456_v1, %v326_v23  ;;  %v585_v25 = vpop.f32.mrb[3].mxu0 }
 0x2b0   :  { %v330_v26 = vmax.f32 %v327_v24, 0.0 }
 0x2b2   :  { %619 = vmatmul.mubr.f32.vlgmr.msra.gmra.mrb[2].mxu1 %v330_v26 }
 0x385   :  { %v420_v28 = vpop.f32.mrb[2].mxu1 }
 0x386   :  { %v421_v29 = vadd.f32 %v457_v27, %v420_v28  ;;  %v620_v30 = vpop.f32.mrb[3].mxu1 }
 0x388   :  { %v425_v31 = vsel %vm424_vm2, %v421_v29, -inf }
 0x389   :  { %426 = vmax.xlane.f32.xlu0 %v425_v31 }
 0x416   :  { %v427_v32 = vpop.xlane.xlu0 %426 }
 0x417   :  { %v428_v33 = vsub.f32 %v421_v29, %v427_v32 }
 0x419   :  { %v429_v34 = vmul.f32 1.442695, %v428_v33 }
 0x41b   :  { %701 = vpow2.f32 %v429_v34 }
 0x425   :  { %v702_v35 = vpop.eup %701 }
 0x426   :  { %v431_v36 = vsel %vm424_vm2, %v702_v35, 0.0 }
 0x427   :  { %432 = vadd.xlane.f32.xlu0 %v431_v36 }
 0x4b4   :  { %v433_v37 = vpop.xlane.xlu0 %432 }
 0x4b5   :  { %703 = vrcp.f32 %v433_v37 }
 0x4bf   :  { %v704_v38 = vpop.eup %703 }
 0x4c0   :  { %v435_v39 = vmul.f32 %v704_v38, %v702_v35 }
 0x4c2   :  { %436 = vst.msk [vmem:[#allocation7] sm:$0xff] %vm424_vm2, %v435_v39 }
 0x4c3   :  { %760 = shalt.err (!%p757_p6)
}
 0x4c4   :  { %s761_s13 = scalar_lea.hbm %s1034_s9, 128 }
 0x4c5   :  { %p762_p7 = scmp.ne.s32.totalorder %s1034_s9, %s761_s13  ;;  %p765_p8 = scmp.lt.u32.totalorder %s761_s13, %s1034_s9 }
 0x4c7   :  { %p767_p9 = pnand %p765_p8, %p762_p7 }
 0x4c9   :  { %770 = shalt.err (!%p767_p9)
}
 0x4ca   :  { %446 = dma.vmem_to_hbm [thread:$0]  %s444_s7, 128, %s1034_s9, [#allocation4]  }
 0x4cb   :  { %775 = dma.done.wait [#allocation4], 128  }
 0x4cc   :  { %776 = vsyncadd [#allocation4], 4294967168 }
 0x4cd   :  { %450 = vsyncpa [#allocation3], 1 }
 0x4ce   :  { %451 = vsyncpa [#allocation6], 1 }
 0x4cf   :  { %452 = vsyncpa [#allocation4], 1 }

</bundles_post_ra>
